<compile_context>
chip_gen: v7x
topology: tpu7x:2x2x1
jax: 0.10.0
libtpu: 0.0.40
codegen_flags: <defaults>
</compile_context>

<pallas_src>
import math
import jax
import jax.numpy as jnp
from jax.experimental import pallas as pl
from jax.experimental.pallas import tpu as pltpu


def _build_pe(d_model: int, max_len: int = 5000) -> jnp.ndarray:
    """Sinusoidal positional-encoding buffer, shape (1, max_len, d_model), f32.
    NOTE: like the PyTorch reference, assumes d_model is even."""
    position = jnp.arange(max_len, dtype=jnp.float32)[:, None]                # (max_len, 1)
    div_term = jnp.exp(jnp.arange(0, d_model, 2, dtype=jnp.float32)
                       * (-math.log(10000.0) / d_model))                      # (d_model//2,)
    ang = position * div_term                                                 # (max_len, d_model//2)
    pe = jnp.zeros((max_len, d_model), dtype=jnp.float32)
    pe = pe.at[:, 0::2].set(jnp.sin(ang))
    pe = pe.at[:, 1::2].set(jnp.cos(ang))
    return pe[None, :, :]                                                     # (1, max_len, d_model)


def _pos_enc_kernel(x_ref, pe_ref, o_ref):
    # x_ref: (B, tl) block; pe_ref: (1, tl) f32 block (broadcasts over batch).
    # Add in f32 (matches the PyTorch f32-buffer promotion), cast to out dtype.
    # Pure VPU work; tl is a multiple of 128, so only a final partial block (if
    # any) uses masked stores.
    o_ref[...] = (x_ref[...].astype(jnp.float32) + pe_ref[...]).astype(o_ref.dtype)


def _ceil_to(v: int, m: int) -> int:
    return -(-v // m) * m


def _block_footprint_bytes(tl: int, B: int, x_itemsize: int) -> int:
    """Real (sublane-padded, double-buffered) VMEM footprint of one grid step."""
    b_pad = _ceil_to(max(B, 1), 8)                     # B<8 still occupies 8 sublanes
    #    2x x-in dbuf      + 2x out dbuf     + 2x f32 pe row dbuf (8 sublanes each)
    return (2 * b_pad * x_itemsize + 2 * b_pad * x_itemsize + 2 * 8 * 4) * tl


def _vmem_step_budget_bytes() -> int:
    """Generation-aware per-grid-step VMEM footprint budget."""
    try:
        vmem = int(pltpu.get_tpu_info().vmem_capacity_bytes)
    except Exception:
        vmem = 0
    if vmem <= 0:
        return 12 << 20                                # safe fallback on any generation
    # ~1/4 of physical VMEM: 24 MiB on v5e/v6e (128 MiB), 16 MiB on v7x (64 MiB/TC).
    return min(24 << 20, vmem // 4)


def _pick_tile_cols(L: int, B: int, x_itemsize: int, budget_bytes: int,
                    max_cols=None) -> int:
    """Largest multiple-of-128 lane tile whose real VMEM footprint fits the budget.
    Does NOT need to divide L (grid uses pl.cdiv with a masked partial last block)."""
    per_col = _block_footprint_bytes(1, B, x_itemsize)
    cap = max(128, (budget_bytes // per_col) // 128 * 128)
    if max_cols is not None:
        cap = max(128, min(cap, (max_cols // 128) * 128))
    L_pad = _ceil_to(L, 128)
    if cap >= L_pad and L_pad >= 2 * 512:
        # Keep >=2 grid steps so both v7x TensorCores get work, as long as each
        # half stays >=512 lanes (still ~85%+ of the HBM roofline).
        cap = max(512, _ceil_to(-(-L // 2), 128))
    return min(cap, L_pad)


def positional_encoding(x: jnp.ndarray, pe: jnp.ndarray, *,
                        force_pallas: bool = False,
                        max_cols=None) -> jnp.ndarray:
    """x: (B, S, D); pe: (1, max_len, D) float32 buffer. Returns x + pe[:, :S, :]
    (computed in f32, cast back to x.dtype)."""
    B, S, D = x.shape
    L = S * D
    itemsize = jnp.dtype(x.dtype).itemsize

    # Plain-XLA fast path: problems small enough that pallas_call launch overhead
    # dominates (fused XLA elementwise add is already at roofline there).
    if not force_pallas and B * L * itemsize < (4 << 20):
        return (x.astype(jnp.float32) + pe[:, :S, :]).astype(x.dtype)

    # Layout plumbing only: flatten (S, D) to one lane-dense axis. The :S prefix
    # of pe is contiguous, so the whole flattened buffer is passed without any
    # slice/cast copy; the grid only ever touches its first L columns.
    x2 = x.reshape(B, L)
    pe2 = pe.reshape(1, -1)                            # (1, max_len*D), f32

    budget = _vmem_step_budget_bytes()
    tl = _pick_tile_cols(L, B, itemsize, budget, max_cols=max_cols)
    grid = pl.cdiv(L, tl)
    vmem_limit = _block_footprint_bytes(tl, B, itemsize) + (8 << 20)

    out2 = pl.pallas_call(
        _pos_enc_kernel,
        out_shape=jax.ShapeDtypeStruct((B, L), x.dtype),
        grid=(grid,),
        in_specs=[
            pl.BlockSpec((B, tl), lambda l: (0, l)),   # x:  full batch, lane-dense tile
            pl.BlockSpec((1, tl), lambda l: (0, l)),   # pe: one f32 row per tile
        ],
        out_specs=pl.BlockSpec((B, tl), lambda l: (0, l)),
        compiler_params=pltpu.CompilerParams(
            dimension_semantics=("parallel",),         # megacore / v7x dual-TC sharding
            vmem_limit_bytes=int(vmem_limit),
        ),
    )(x2, pe2)
    return out2.reshape(B, S, D)


if __name__ == "__main__":
    MAX_LEN = 128  # buffer length >= seq_len (PyTorch default is 5000; small here for speed)
    key = jax.random.PRNGKey(0)

    # Case 1: small shape implied by the module (B=2, seq=8, d_model=32) — single grid step.
    B, S, D = 2, 8, 32
    x = jax.random.normal(key, (B, S, D), dtype=jnp.float32)
    pe = _build_pe(D, MAX_LEN)
    out = jax.block_until_ready(positional_encoding(x, pe, force_pallas=True))
    ref = x + pe[:, :S, :]
    assert out.shape == (B, S, D)
    assert jnp.allclose(out, ref, atol=1e-6), "mismatch vs reference (case 1)"

    # Case 2: lane-ragged L with a capped tile -> grid > 1 and a masked partial
    # last block (L = 40*24 = 960, tl = 512).
    B2, S2, D2 = 2, 40, 24
    x_b = jax.random.normal(jax.random.PRNGKey(0), (B2, S2, D2), dtype=jnp.float32)
    pe_b = _build_pe(D2, MAX_LEN)
    out_b = jax.block_until_ready(
        positional_encoding(x_b, pe_b, force_pallas=True, max_cols=512))
    ref_b = x_b + pe_b[:, :S2, :]
    assert jnp.allclose(out_b, ref_b, atol=1e-6), "mismatch vs reference (case 2)"

    # Case 3: bf16 input, L = 2048 -> auto-split into 2 parallel grid steps; add
    # done in f32 in-kernel, output cast back to bf16.
    B3, S3, D3 = 2, 64, 32
    x_c = jax.random.normal(jax.random.PRNGKey(0), (B3, S3, D3), dtype=jnp.bfloat16)
    pe_c = _build_pe(D3, MAX_LEN)
    out_c = jax.block_until_ready(positional_encoding(x_c, pe_c, force_pallas=True))
    ref_c = (x_c.astype(jnp.float32) + pe_c[:, :S3, :]).astype(jnp.bfloat16)
    assert jnp.allclose(out_c.astype(jnp.float32), ref_c.astype(jnp.float32),
                        atol=2e-2), "mismatch vs reference (case 3)"

    print("KERNEL_OK")
</pallas_src>

<mosaic_0001>
module attributes {stable_mosaic.version = 11 : i64} {
  func.func @_pos_enc_kernel(%arg0: i32, %arg1: memref<2x256xf32, #tpu.memory_space<vmem>>, %arg2: memref<1x256xf32, #tpu.memory_space<vmem>>, %arg3: memref<2x256xf32, #tpu.memory_space<vmem>>) attributes {dimension_semantics = [#tpu.dimension_semantics<parallel>], iteration_bounds = array<i64: 1>, scalar_prefetch = 0 : i64, scratch_operands = 0 : i64, tpu.core_type = #tpu.core_type<tc>, window_params = [{transform_indices = @transform_0, window_bounds = array<i64: 2, 256>}, {transform_indices = @transform_1, window_bounds = array<i64: 1, 256>}, {transform_indices = @transform_2, window_bounds = array<i64: 2, 256>}]} {
    %c0 = arith.constant 0 : index
    %c0_0 = arith.constant 0 : index
    %0 = vector.load %arg1[%c0, %c0_0] : memref<2x256xf32, #tpu.memory_space<vmem>>, vector<2x256xf32>
    %c0_1 = arith.constant 0 : index
    %c0_2 = arith.constant 0 : index
    %1 = vector.load %arg2[%c0_1, %c0_2] : memref<1x256xf32, #tpu.memory_space<vmem>>, vector<1x256xf32>
    %2 = vector.broadcast %1 : vector<1x256xf32> to vector<2x256xf32>
    %3 = arith.addf %0, %2 : vector<2x256xf32>
    %c0_3 = arith.constant 0 : index
    %c0_4 = arith.constant 0 : index
    %4 = vector.load %arg3[%c0_3, %c0_4] : memref<2x256xf32, #tpu.memory_space<vmem>>, vector<2x256xf32>
    tpu.vector_store %arg3[%c0_3, %c0_4], %3 {strides = array<i32>} : memref<2x256xf32, #tpu.memory_space<vmem>>, vector<2x256xf32>,
    return
  }
  func.func @transform_0(%arg0: i32) -> (i32, i32) {
    %c0_i32 = arith.constant 0 : i32
    %c0_i32_0 = arith.constant 0 : i32
    return %c0_i32, %arg0 : i32, i32
  }
  func.func @transform_1(%arg0: i32) -> (i32, i32) {
    %c0_i32 = arith.constant 0 : i32
    %c0_i32_0 = arith.constant 0 : i32
    return %c0_i32, %arg0 : i32, i32
  }
  func.func @transform_2(%arg0: i32) -> (i32, i32) {
    %c0_i32 = arith.constant 0 : i32
    %c0_i32_0 = arith.constant 0 : i32
    return %c0_i32, %arg0 : i32, i32
  }
}

</mosaic_0001>

<bundles_post_ra>
// kernel: tpu_custom_call.1
= control target key start
LH: loop header
LB: loop body
LE: loop exit
PB: predicated region body
PF: predicated region fallthrough
CT: control target
= control target key end

     0   :  { %7 = vsyncpa [#allocation3], 0  ;;  %s215_s0 = inlined_call_operand.hbm [shape: f32[2,256], index: 0, kind: input, shape index: {}]   ;;  %s216_s1 = inlined_call_operand.hbm [shape: f32[1,4096], index: 1, kind: input, shape index: {}]   ;;  %s217_s2 = inlined_call_operand.hbm [shape: f32[2,256], index: 2, kind: output, shape index: {}]  }
   0x1   :  { %8 = vsyncpa [#allocation6], 0 }
   0x2   :  { %9 = vsyncpa [#allocation4], 0  ;;  %s150_s9 = smov [#allocation2]   ;;  %s151_s11 = smov [#allocation5]  }
   0x3   :  { %s16_s10 = sshll.u32 %s150_s9, 4  ;;  %s26_s12 = sshll.u32 %s151_s11, 4  ;;  %s17_s10 = int_to_ptr.vmem [resolvable:$true] %s16_s10  ;;  %s169_s12 = int_to_ptr.vmem [resolvable:$true] %s26_s12 }
   0x4   :  { %s78_s15 = scalar_lea.hbm %s215_s0, 64 }
   0x5   :  { %p79_p0 = scmp.ne.s32.totalorder %s215_s0, %s78_s15  ;;  %p82_p1 = scmp.lt.u32.totalorder %s78_s15, %s215_s0 }
   0x7   :  { %p84_p2 = pnand %p82_p1, %p79_p0 }
   0x9   :  { %87 = shalt.err (!%p84_p2)
}
   0xa   :  { %s88_s20 = scalar_lea.vmem %s17_s10, 64  ;;  %p93_p4 = scmp.lt.s32.totalorder %s17_s10, %s17_s10 }
   0xb   :  { %p89_p3 = scmp.ne.s32.totalorder %s17_s10, %s88_s20  ;;  %p94_p5 = scmp.lt.s32.totalorder %s88_s20, %s88_s20 }
   0xd   :  { %p95_p6 = por %p94_p5, %p93_p4 }
   0xf   :  { %p96_p7 = pnand %p95_p6, %p89_p3 }
  0x11   :  { %99 = shalt.err (!%p96_p7)
}
  0x12   :  { %19 = dma.hbm_to_vmem [thread:$0]  %s215_s0, 64, %s17_s10, [#allocation3]  }
  0x13   :  { %s100_s25 = scalar_lea.hbm %s216_s1, 32  ;;  %s102_s30 = scalar_lea.hbm %s216_s1, 512 }
  0x14   :  { %p101_p8 = scmp.ne.s32.totalorder %s216_s1, %s100_s25  ;;  %p103_p9 = scmp.lt.u32.totalorder %s102_s30, %s100_s25 }
  0x15   :  { %p104_p10 = scmp.lt.u32.totalorder %s100_s25, %s216_s1 }
  0x17   :  { %p105_p11 = por %p104_p10, %p103_p9 }
  0x19   :  { %p106_p12 = pnand %p105_p11, %p101_p8 }
  0x1b   :  { %109 = shalt.err (!%p106_p12)
}
  0x1c   :  { %s110_s0 = scalar_lea.vmem %s169_s12, 32  ;;  %p115_p0 = scmp.lt.s32.totalorder %s169_s12, %s169_s12 }
  0x1d   :  { %p111_p13 = scmp.ne.s32.totalorder %s169_s12, %s110_s0  ;;  %p116_p1 = scmp.lt.s32.totalorder %s110_s0, %s110_s0 }
  0x1f   :  { %p117_p2 = por %p116_p1, %p115_p0 }
  0x21   :  { %p118_p3 = pnand %p117_p2, %p111_p13 }
  0x23   :  { %121 = shalt.err (!%p118_p3)
}
  0x24   :  { %29 = dma.hbm_to_vmem [thread:$0]  %s216_s1, 32, %s169_s12, [#allocation6]  }
  0x25   :  { %144 = dma.done.wait [#allocation3], 64  }
  0x26   :  { %145 = vsyncadd [#allocation3], 4294967232 }
  0x27   :  { %146 = dma.done.wait [#allocation6], 32  }
  0x28   :  { %147 = vsyncadd [#allocation6], 4294967264  ;;  %v39_v0 = vlaneseq  ;;  %v152_v1 = vmov 1983009808   ;;  %v37_v7 = vld [vmem:[#allocation5] sm:$0x3] }
  0x29   :  { %v49_v2 = vunpack.c.l.s4 %v152_v1  ;;  %v36_v12 = vld [vmem:[#allocation2] sm:$0xf]  ;;  %s153_s7 = smov [#allocation7]  }
  0x2a   :  { %v40_v3 = vshrl.u32 %v39_v0, 7  ;;  %s64_s8 = sshll.u32 %s153_s7, 4  ;;  %s65_s8 = int_to_ptr.vmem [resolvable:$true] %s64_s8 }
  0x2b   :  { %v50_v6 = vunpack.c.0.s8 %v49_v2  ;;  %s122_s1 = scalar_lea.vmem %s65_s8, 64  ;;  %p127_p5 = scmp.lt.s32.totalorder %s65_s8, %s65_s8 }
  0x2c   :  { %v41_v4 = vsub.s32 0, %v40_v3  ;;  %v45_v5 = vsub.s32 1, %v40_v3  ;;  %p123_p4 = scmp.ne.s32.totalorder %s65_s8, %s122_s1  ;;  %p128_p6 = scmp.lt.s32.totalorder %s122_s1, %s122_s1 }
  0x2d   :  { %v53_v10 = vsub.s32 %v50_v6, %v40_v3 }
  0x2e   :  { %v42_v8 = vrot.slane %v37_v7, %v41_v4  ;;  %v46_v9 = vrot.slane %v37_v7, %v45_v5  ;;  %p129_p7 = por %p128_p6, %p127_p5 }
  0x30   :  { %v47_v11 = vcombine.low %v42_v8, %v46_v9  ;;  %p130_p8 = pnand %p129_p7, %p123_p4 }
  0x32   :  { %v54_v13 = vrot.slane %v47_v11, %v53_v10 }
  0x34   :  { %v56_v14 = vadd.f32 %v54_v13, %v36_v12 }
  0x36   :  { %57 = vst [vmem:[#allocation7] sm:$0xf] %v56_v14 }
  0x37   :  { %133 = shalt.err (!%p130_p8)
}
  0x38   :  { %s134_s11 = scalar_lea.hbm %s217_s2, 64 }
  0x39   :  { %p135_p9 = scmp.ne.s32.totalorder %s217_s2, %s134_s11  ;;  %p138_p10 = scmp.lt.u32.totalorder %s134_s11, %s217_s2 }
  0x3b   :  { %p140_p11 = pnand %p138_p10, %p135_p9 }
  0x3d   :  { %143 = shalt.err (!%p140_p11)
}
  0x3e   :  { %67 = dma.vmem_to_hbm [thread:$0]  %s65_s8, 64, %s217_s2, [#allocation4]  }
  0x3f   :  { %148 = dma.done.wait [#allocation4], 64  }
  0x40   :  { %149 = vsyncadd [#allocation4], 4294967232 }
  0x41   :  { %71 = vsyncpa [#allocation3], 1 }
  0x42   :  { %72 = vsyncpa [#allocation6], 1 }
  0x43   :  { %73 = vsyncpa [#allocation4], 1 }

</bundles_post_ra>
